<compile_context>
chip_gen: v6e
topology: v6e:2x2x1
jax: 0.10.0
libtpu: 0.0.40
codegen_flags: <defaults>
</compile_context>

<pallas_src>
import functools

import jax
import jax.numpy as jnp
from jax.experimental import pallas as pl
from jax.experimental.pallas import tpu as pltpu

# Keep f32 matmul precision identical between the Pallas kernels and the
# pure-JAX reference used for the correctness check.
jax.config.update("jax_default_matmul_precision", "highest")


# -----------------------------------------------------------------------------
# helpers
# -----------------------------------------------------------------------------
def _round_up(n, m):
    return ((n + m - 1) // m) * m


def _pad_rows(x, rows):
    pad = rows - x.shape[0]
    if pad == 0:
        return x
    return jnp.pad(x, ((0, pad), (0, 0)))


# -----------------------------------------------------------------------------
# Kernel 1: row-tiled Linear (+ optional ReLU):  y = x @ W + b
#   grid (row_tiles,), weight & bias blocks are grid-invariant -> resident.
# -----------------------------------------------------------------------------
def _linear_kernel(x_ref, w_ref, b_ref, o_ref, *, act):
    y = jnp.dot(x_ref[...], w_ref[...], preferred_element_type=jnp.float32)
    y = y + b_ref[...]
    if act == "relu":
        y = jnp.maximum(y, 0.0)
    o_ref[...] = y.astype(o_ref.dtype)


def linear_pallas(x, w, b, *, act=None, tile_rows=256):
    """x: (R, K), w: (K, N), b: (N,) -> (R, N), tiled over rows."""
    R, K = x.shape
    Kw, N = w.shape
    assert K == Kw
    tr = min(tile_rows, _round_up(R, 8))
    Rp = _round_up(R, tr)
    xp = _pad_rows(x, Rp)
    out = pl.pallas_call(
        functools.partial(_linear_kernel, act=act),
        out_shape=jax.ShapeDtypeStruct((Rp, N), x.dtype),
        grid=(Rp // tr,),
        in_specs=[
            pl.BlockSpec((tr, K), lambda i: (i, 0)),   # x row tile
            pl.BlockSpec((K, N), lambda i: (0, 0)),    # weight (resident)
            pl.BlockSpec((1, N), lambda i: (0, 0)),    # bias   (resident)
        ],
        out_specs=pl.BlockSpec((tr, N), lambda i: (i, 0)),
        compiler_params=pltpu.CompilerParams(dimension_semantics=("parallel",)),
    )(xp, w, b.reshape(1, N))
    return out[:R]


# -----------------------------------------------------------------------------
# Kernel 2: row-tiled LayerNorm (PyTorch semantics: biased var, eps=1e-5)
# -----------------------------------------------------------------------------
def _layernorm_kernel(x_ref, g_ref, b_ref, o_ref, *, eps):
    x = x_ref[...].astype(jnp.float32)
    mu = jnp.mean(x, axis=-1, keepdims=True)
    xc = x - mu
    var = jnp.mean(xc * xc, axis=-1, keepdims=True)
    inv = jax.lax.rsqrt(var + eps)
    o_ref[...] = (xc * inv * g_ref[...] + b_ref[...]).astype(o_ref.dtype)


def layernorm_pallas(x, gamma, beta, *, eps=1e-5, tile_rows=256):
    R, C = x.shape
    tr = min(tile_rows, _round_up(R, 8))
    Rp = _round_up(R, tr)
    xp = _pad_rows(x, Rp)
    out = pl.pallas_call(
        functools.partial(_layernorm_kernel, eps=eps),
        out_shape=jax.ShapeDtypeStruct((Rp, C), x.dtype),
        grid=(Rp // tr,),
        in_specs=[
            pl.BlockSpec((tr, C), lambda i: (i, 0)),
            pl.BlockSpec((1, C), lambda i: (0, 0)),
            pl.BlockSpec((1, C), lambda i: (0, 0)),
        ],
        out_specs=pl.BlockSpec((tr, C), lambda i: (i, 0)),
        compiler_params=pltpu.CompilerParams(dimension_semantics=("parallel",)),
    )(xp, gamma.reshape(1, C), beta.reshape(1, C))
    return out[:R]


# -----------------------------------------------------------------------------
# Kernel 3: per-(batch, head) softmax attention core.
#   q/k/v blocks are read straight out of the fused qkv activation; the output
#   block is the head's hd-wide column slice of the (B, N, C) ctx.
# -----------------------------------------------------------------------------
def _attn_kernel(q_ref, k_ref, v_ref, o_ref, *, scale):
    q = q_ref[0] * scale                       # (N, hd) -- fold scale into q
    k = k_ref[0]
    v = v_ref[0]
    logits = jax.lax.dot_general(              # q @ k^T -> (N, N), f32 acc
        q, k, dimension_numbers=(((1,), (1,)), ((), ())),
        preferred_element_type=jnp.float32)
    m = jnp.max(logits, axis=-1, keepdims=True)
    p = jnp.exp(logits - m)
    l = jnp.sum(p, axis=-1, keepdims=True)
    ctx = jnp.dot(p, v, preferred_element_type=jnp.float32)   # (N, hd)
    # Normalise AFTER p@v: (N,hd) multiply instead of (N,N); the attention map
    # is never written to HBM (ViT's Block discards it).
    o_ref[0] = (ctx / l).astype(o_ref.dtype)


def attention_ctx_pallas(qkv, num_heads, head_dim, scale):
    """qkv: (B, N, 3*C) fused projection output, column layout
    [q_h0 .. q_h(H-1) | k_h0 .. | v_h0 ..] with head_dim columns per head.
    Returns ctx in (B, N, C) head-merged layout."""
    B, N, three_c = qkv.shape
    C = num_heads * head_dim
    assert three_c == 3 * C
    kern = functools.partial(_attn_kernel, scale=scale)
    cparams = pltpu.CompilerParams(dimension_semantics=("parallel", "parallel"))

    if head_dim % 128 == 0:
        # Fast path: no transposes, lane-dense (hd % 128 == 0) output stores,
        # ctx lands directly in (B, N, C) layout.
        return pl.pallas_call(
            kern,
            out_shape=jax.ShapeDtypeStruct((B, N, C), qkv.dtype),
            grid=(B, num_heads),
            in_specs=[
                pl.BlockSpec((1, N, head_dim), lambda b, h: (b, 0, h)),
                pl.BlockSpec((1, N, head_dim),
                             lambda b, h: (b, 0, num_heads + h)),
                pl.BlockSpec((1, N, head_dim),
                             lambda b, h: (b, 0, 2 * num_heads + h)),
            ],
            out_specs=pl.BlockSpec((1, N, head_dim), lambda b, h: (b, 0, h)),
            compiler_params=cparams,
        )(qkv, qkv, qkv)

    # Fallback for head_dim not a multiple of 128 (e.g. 192): split heads with
    # a plain-JAX transpose so every Pallas block covers full trailing dims.
    qkv5 = qkv.reshape(B, N, 3, num_heads, head_dim).transpose(2, 0, 3, 1, 4)
    qkv5 = qkv5.reshape(3, B * num_heads, N, head_dim)
    q, k, v = qkv5[0], qkv5[1], qkv5[2]
    ctx = pl.pallas_call(
        kern,
        out_shape=jax.ShapeDtypeStruct((B * num_heads, N, head_dim), qkv.dtype),
        grid=(B, num_heads),
        in_specs=[
            pl.BlockSpec((1, N, head_dim),
                         lambda b, h: (b * num_heads + h, 0, 0)),
            pl.BlockSpec((1, N, head_dim),
                         lambda b, h: (b * num_heads + h, 0, 0)),
            pl.BlockSpec((1, N, head_dim),
                         lambda b, h: (b * num_heads + h, 0, 0)),
        ],
        out_specs=pl.BlockSpec((1, N, head_dim),
                               lambda b, h: (b * num_heads + h, 0, 0)),
        compiler_params=cparams,
    )(q, k, v)
    return (ctx.reshape(B, num_heads, N, head_dim)
               .transpose(0, 2, 1, 3).reshape(B, N, C))


# -----------------------------------------------------------------------------
# Glue: patch extraction (layout only; the matmul is done by linear_pallas).
# Conv2d(kernel=stride=patch) == flatten each patch in (c, ph, pw) order and
# multiply by the conv weight reshaped to (embed_dim, c*p*p)^T.
# -----------------------------------------------------------------------------
def extract_patches(x, patch_size):
    B, cin, H, W = x.shape
    p = patch_size
    hn, wn = H // p, W // p
    x = x.reshape(B, cin, hn, p, wn, p)
    x = x.transpose(0, 2, 4, 1, 3, 5)          # (B, hn, wn, cin, p, p)
    return x.reshape(B, hn * wn, cin * p * p)


# -----------------------------------------------------------------------------
# Full ViT forward (Pallas path)
# -----------------------------------------------------------------------------
def vit_forward(params, x, cfg):
    B = x.shape[0]
    C = cfg["embed_dim"]
    H = cfg["num_heads"]
    hd = C // H
    scale = float(hd) ** (-0.8)                # qk_scale=None -> head_dim**-0.8
    p = cfg["patch_size"]

    # patch embedding
    patches = extract_patches(x, p)
    P = patches.shape[1]
    tok = linear_pallas(patches.reshape(B * P, -1),
                        params["patch_w"], params["patch_b"]).reshape(B, P, C)

    # cls token + positional embedding (pos_drop p=0 -> identity)
    cls = jnp.broadcast_to(params["cls_token"], (B, 1, C))
    xt = jnp.concatenate([cls, tok], axis=1) + params["pos_embed"]
    N = xt.shape[1]

    for blk in params["blocks"]:
        # attention branch
        h1 = layernorm_pallas(xt.reshape(B * N, C), blk["ln1_g"], blk["ln1_b"])
        qkv = linear_pallas(h1, blk["w_qkv"], blk["b_qkv"])        # (B*N, 3C)
        ctx = attention_ctx_pallas(qkv.reshape(B, N, 3 * C), H, hd, scale)
        y = linear_pallas(ctx.reshape(B * N, C), blk["w_proj"], blk["b_proj"])
        xt = xt + y.reshape(B, N, C)                               # DropPath p=0
        # MLP branch (hidden = 1000, ReLU, drop p=0)
        h2 = layernorm_pallas(xt.reshape(B * N, C), blk["ln2_g"], blk["ln2_b"])
        m = linear_pallas(h2, blk["w_fc1"], blk["b_fc1"], act="relu")
        m = linear_pallas(m, blk["w_fc2"], blk["b_fc2"])
        xt = xt + m.reshape(B, N, C)

    xn = layernorm_pallas(xt.reshape(B * N, C), params["ln_g"], params["ln_b"])
    cls_out = xn.reshape(B, N, C)[:, 0]                            # (B, C)
    return linear_pallas(cls_out, params["head_w"], params["head_b"])


# -----------------------------------------------------------------------------
# Pure-JAX reference (mirrors the PyTorch forward exactly)
# -----------------------------------------------------------------------------
def _layer_norm_ref(x, g, b, eps=1e-5):
    mu = jnp.mean(x, axis=-1, keepdims=True)
    var = jnp.mean(jnp.square(x - mu), axis=-1, keepdims=True)
    return (x - mu) * jax.lax.rsqrt(var + eps) * g + b


def vit_reference(params, x, cfg):
    B = x.shape[0]
    C = cfg["embed_dim"]
    H = cfg["num_heads"]
    hd = C // H
    scale = float(hd) ** (-0.8)
    p = cfg["patch_size"]

    patches = extract_patches(x, p)
    tok = patches @ params["patch_w"] + params["patch_b"]
    cls = jnp.broadcast_to(params["cls_token"], (B, 1, C))
    xt = jnp.concatenate([cls, tok], axis=1) + params["pos_embed"]
    N = xt.shape[1]

    for blk in params["blocks"]:
        h1 = _layer_norm_ref(xt, blk["ln1_g"], blk["ln1_b"])
        qkv = (h1 @ blk["w_qkv"] + blk["b_qkv"]).reshape(B, N, 3, H, hd)
        qkv = qkv.transpose(2, 0, 3, 1, 4)
        q, k, v = qkv[0], qkv[1], qkv[2]
        attn = jax.nn.softmax((q @ jnp.swapaxes(k, -2, -1)) * scale, axis=-1)
        y = (attn @ v).transpose(0, 2, 1, 3).reshape(B, N, C)
        y = y @ blk["w_proj"] + blk["b_proj"]
        xt = xt + y
        h2 = _layer_norm_ref(xt, blk["ln2_g"], blk["ln2_b"])
        m = jax.nn.relu(h2 @ blk["w_fc1"] + blk["b_fc1"])
        xt = xt + (m @ blk["w_fc2"] + blk["b_fc2"])

    xt = _layer_norm_ref(xt, params["ln_g"], params["ln_b"])
    return xt[:, 0] @ params["head_w"] + params["head_b"]


# -----------------------------------------------------------------------------
# Deterministic parameter init
# -----------------------------------------------------------------------------
def init_params(key, cfg):
    C = cfg["embed_dim"]
    depth = cfg["depth"]
    hid = cfg["mlp_hidden"]                    # module hard-codes int(1000)
    p = cfg["patch_size"]
    cin = cfg["in_chans"]
    patch_dim = cin * p * p
    n_patches = (cfg["img_size"] // p) ** 2
    nc = cfg["num_classes"]

    keys = iter(jax.random.split(key, 8 + 8 * depth))

    def nrm(shape, std=0.02):
        return std * jax.random.normal(next(keys), shape, jnp.float32)

    params = dict(
        patch_w=nrm((patch_dim, C)),
        patch_b=jnp.zeros((C,), jnp.float32),
        cls_token=nrm((1, 1, C)),
        pos_embed=nrm((1, n_patches + 1, C)),
        ln_g=jnp.ones((C,), jnp.float32),
        ln_b=jnp.zeros((C,), jnp.float32),
        head_w=nrm((C, nc)),
        head_b=jnp.zeros((nc,), jnp.float32),
        blocks=[],
    )
    for _ in range(depth):
        params["blocks"].append(dict(
            ln1_g=jnp.ones((C,), jnp.float32), ln1_b=jnp.zeros((C,), jnp.float32),
            w_qkv=nrm((C, 3 * C)),
            b_qkv=jnp.zeros((3 * C,), jnp.float32),     # qkv_bias=False
            w_proj=nrm((C, C)), b_proj=jnp.zeros((C,), jnp.float32),
            ln2_g=jnp.ones((C,), jnp.float32), ln2_b=jnp.zeros((C,), jnp.float32),
            w_fc1=nrm((C, hid)), b_fc1=jnp.zeros((hid,), jnp.float32),
            w_fc2=nrm((hid, C)), b_fc2=jnp.zeros((C,), jnp.float32),
        ))
    return params


# -----------------------------------------------------------------------------
if __name__ == "__main__":
    # Small shapes consistent with the module: 16x16 image, patch 4 -> 16
    # patches (+ cls -> N=17); embed_dim=256 with 2 heads -> head_dim=128;
    # depth=2; MLP hidden=1000 (the module hard-codes it); 10 classes.
    cfg = dict(img_size=16, patch_size=4, in_chans=3, embed_dim=256,
               depth=2, num_heads=2, num_classes=10, mlp_hidden=1000)

    key = jax.random.PRNGKey(0)
    kx, kp = jax.random.split(key)
    x = jax.random.normal(
        kx, (2, cfg["in_chans"], cfg["img_size"], cfg["img_size"]), jnp.float32)
    params = init_params(kp, cfg)

    out = vit_forward(params, x, cfg)
    jax.block_until_ready(out)

    out_ref = vit_reference(params, x, cfg)
    assert out.shape == (2, cfg["num_classes"]), out.shape
    max_err = float(jnp.max(jnp.abs(out - out_ref)))
    assert jnp.allclose(out, out_ref, atol=5e-3, rtol=5e-3), \
        f"mismatch: max abs err = {max_err}"

    print("KERNEL_OK")
</pallas_src>

<mosaic_0001>
module attributes {stable_mosaic.version = 11 : i64} {
  func.func @_linear_kernel(%arg0: i32, %arg1: memref<32x48xf32, #tpu.memory_space<vmem>>, %arg2: memref<48x256xf32, #tpu.memory_space<vmem>>, %arg3: memref<1x256xf32, #tpu.memory_space<vmem>>, %arg4: memref<32x256xf32, #tpu.memory_space<vmem>>) attributes {dimension_semantics = [#tpu.dimension_semantics<parallel>], iteration_bounds = array<i64: 1>, scalar_prefetch = 0 : i64, scratch_operands = 0 : i64, tpu.core_type = #tpu.core_type<tc>, window_params = [{transform_indices = @transform_0, window_bounds = array<i64: 32, 48>}, {pipeline_mode = #tpu.pipeline_mode<synchronous>, transform_indices = @transform_1, window_bounds = array<i64: 48, 256>}, {pipeline_mode = #tpu.pipeline_mode<synchronous>, transform_indices = @transform_2, window_bounds = array<i64: 1, 256>}, {transform_indices = @transform_3, window_bounds = array<i64: 32, 256>}]} {
    %c0 = arith.constant 0 : index
    %c0_0 = arith.constant 0 : index
    %0 = vector.load %arg1[%c0, %c0_0] : memref<32x48xf32, #tpu.memory_space<vmem>>, vector<32x48xf32>
    %c0_1 = arith.constant 0 : index
    %c0_2 = arith.constant 0 : index
    %1 = vector.load %arg2[%c0_1, %c0_2] : memref<48x256xf32, #tpu.memory_space<vmem>>, vector<48x256xf32>
    %cst = arith.constant dense<0.000000e+00> : vector<32x256xf32>
    %2 = tpu.matmul %0, %1, %cst {dimension_numbers = #tpu.dot_dimension_numbers<[1], [0], [0], [1], [0, 0, 1, 1], [], []>, precision = #tpu.contract_precision<fp32>} : vector<32x48xf32>, vector<48x256xf32>, vector<32x256xf32> -> vector<32x256xf32>
    %c0_3 = arith.constant 0 : index
    %c0_4 = arith.constant 0 : index
    %3 = vector.load %arg3[%c0_3, %c0_4] : memref<1x256xf32, #tpu.memory_space<vmem>>, vector<1x256xf32>
    %4 = vector.broadcast %3 : vector<1x256xf32> to vector<32x256xf32>
    %5 = arith.addf %2, %4 : vector<32x256xf32>
    %c0_5 = arith.constant 0 : index
    %c0_6 = arith.constant 0 : index
    %6 = vector.load %arg4[%c0_5, %c0_6] : memref<32x256xf32, #tpu.memory_space<vmem>>, vector<32x256xf32>
    tpu.vector_store %arg4[%c0_5, %c0_6], %5 {strides = array<i32>} : memref<32x256xf32, #tpu.memory_space<vmem>>, vector<32x256xf32>,
    return
  }
  func.func @transform_0(%arg0: i32) -> (i32, i32) {
    %c0_i32 = arith.constant 0 : i32
    %c0_i32_0 = arith.constant 0 : i32
    return %arg0, %c0_i32 : i32, i32
  }
  func.func @transform_1(%arg0: i32) -> (i32, i32) {
    %c0_i32 = arith.constant 0 : i32
    %c0_i32_0 = arith.constant 0 : i32
    %c0_i32_1 = arith.constant 0 : i32
    return %c0_i32, %c0_i32_0 : i32, i32
  }
  func.func @transform_2(%arg0: i32) -> (i32, i32) {
    %c0_i32 = arith.constant 0 : i32
    %c0_i32_0 = arith.constant 0 : i32
    %c0_i32_1 = arith.constant 0 : i32
    return %c0_i32, %c0_i32_0 : i32, i32
  }
  func.func @transform_3(%arg0: i32) -> (i32, i32) {
    %c0_i32 = arith.constant 0 : i32
    %c0_i32_0 = arith.constant 0 : i32
    return %arg0, %c0_i32 : i32, i32
  }
}

</mosaic_0001>

<bundles_post_ra>
// kernel: tpu_custom_call.1
= control target key start
LH: loop header
LB: loop body
LE: loop exit
PB: predicated region body
PF: predicated region fallthrough
CT: control target
= control target key end

     0   :  { %8 = vsyncpa [#allocation3], 0  ;;  %s1258_s0 = inlined_call_operand.hbm [shape: f32[32,48], index: 0, kind: input, shape index: {}]   ;;  %s1259_s1 = inlined_call_operand.hbm [shape: f32[48,256], index: 1, kind: input, shape index: {}]   ;;  %s1260_s2 = inlined_call_operand.vmem [shape: f32[1,256], index: 2, kind: input, shape index: {}]   ;;  %s1261_s3 = inlined_call_operand.hbm [shape: f32[32,256], index: 3, kind: output, shape index: {}]  }
   0x1   :  { %9 = vsyncpa [#allocation6], 0 }
   0x2   :  { %10 = vsyncpa [#allocation4], 0  ;;  %s926_s12 = smov [#allocation2]  }
   0x3   :  { %s16_s13 = sshll.u32 %s926_s12, 4  ;;  %s17_s13 = int_to_ptr.vmem [resolvable:$true] %s16_s13 }
   0x4   :  { %s868_s14 = scalar_lea.vmem %s17_s13, 512  ;;  %p873_p1 = scmp.lt.s32.totalorder %s17_s13, %s17_s13 }
   0x5   :  { %p869_p0 = scmp.ne.s32.totalorder %s17_s13, %s868_s14  ;;  %p874_p2 = scmp.lt.s32.totalorder %s868_s14, %s868_s14 }
   0x7   :  { %p875_p3 = por %p874_p2, %p873_p1 }
   0x9   :  { %p876_p4 = pnand %p875_p3, %p869_p0 }
   0xb   :  { %879 = shalt.err (!%p876_p4)
}
   0xc   :  { %s927_s15 = smov 128   ;;  %s928_s16 = smov 8  }
   0xd   :  { %22 = dma.hbm_to_vmem [thread:$0]  %s1258_s0, 512, %s17_s13, [#allocation3], %s927_s15, %s927_s15, %s928_s16  }
   0xe   :  { %s929_s19 = smov [#allocation5]  }
   0xf   :  { %s28_s20 = sshll.u32 %s929_s19, 4  ;;  %s29_s20 = int_to_ptr.vmem [resolvable:$true] %s28_s20 }
  0x10   :  { %s888_s21 = scalar_lea.vmem %s29_s20, 1536  ;;  %p893_p6 = scmp.lt.s32.totalorder %s29_s20, %s29_s20 }
  0x11   :  { %p889_p5 = scmp.ne.s32.totalorder %s29_s20, %s888_s21  ;;  %p894_p7 = scmp.lt.s32.totalorder %s888_s21, %s888_s21 }
  0x13   :  { %p895_p8 = por %p894_p7, %p893_p6 }
  0x15   :  { %p896_p9 = pnand %p895_p8, %p889_p5 }
  0x17   :  { %899 = shalt.err (!%p896_p9)
}
  0x18   :  { %s930_s22 = smov 256   ;;  %s931_s23 = smov 16  }
  0x19   :  { %34 = dma.hbm_to_vmem [thread:$0]  %s1259_s1, 1536, %s29_s20, [#allocation6], %s930_s22, %s930_s22, %s931_s23  }
  0x1a   :  { %920 = dma.done.wait [#allocation3], 512  }
  0x1b   :  { %921 = vsyncadd [#allocation3], 4294966784 }
  0x1c   :  { %922 = dma.done.wait [#allocation6], 1536  }
  0x1d   :  { %923 = vsyncadd [#allocation6], 4294965760  ;;  %v932_v0 = vmov 0.0   ;;  %v58_v1 = vld [vmem:[#allocation5 + $0x58] sm:$0xff]  ;;  %v57_v2 = vld [vmem:[#allocation5 + $0x50] sm:$0xff]  ;;  %vm71_vm0 = vcmask 392192  }
  0x1e   :  { %160 = vmatprep.mubr.f32.mxu0 %v932_v0  ;;  %329 = vmatprep.mubr.f32.mxu1 %v932_v0  ;;  %v56_v3 = vld [vmem:[#allocation5 + $0x48] sm:$0xff]  ;;  %v965_v4 = vand.u32 4294901760, %v58_v1  ;;  %v967_v5 = vand.u32 4294901760, %v57_v2  ;;  %v55_v7 = vld [vmem:[#allocation5 + $0x40] sm:$0xff]  ;;  %v54_v8 = vld [vmem:[#allocation5 + $0x38] sm:$0xff] }
  0x1f   :  { %v969_v6 = vand.u32 4294901760, %v56_v3  ;;  %v53_v9 = vld [vmem:[#allocation5 + $0x30] sm:$0xff]  ;;  %v971_v10 = vand.u32 4294901760, %v55_v7  ;;  %v973_v11 = vand.u32 4294901760, %v54_v8  ;;  %v52_v13 = vld [vmem:[#allocation5 + $0x28] sm:$0xff]  ;;  %v51_v14 = vld [vmem:[#allocation5 + $0x20] sm:$0xff] }
  0x20   :  { %v975_v12 = vand.u32 4294901760, %v53_v9  ;;  %v50_v15 = vld [vmem:[#allocation5 + $0x18] sm:$0xff]  ;;  %105 = vmatprep.subr.mxu0 %v965_v4  ;;  %v978_v16 = vand.u32 4294901760, %v52_v13  ;;  %v980_v17 = vand.u32 4294901760, %v51_v14  ;;  %v985_v19 = vsub.f32 %v58_v1, %v965_v4  ;;  %v987_v20 = vld [vmem:[#allocation5 + $0x10] sm:$0xff]  ;;  %v989_v21 = vld [vmem:[#allocation5 + $0x8] sm:$0xff] }
  0x21   :  { %v982_v18 = vand.u32 4294901760, %v50_v15  ;;  %v991_v22 = vld [vmem:[#allocation5] sm:$0xff]  ;;  %107 = vmatpush1.msra.mxu0 %v967_v5  ;;  %v995_v23 = vand.u32 4294901760, %v987_v20  ;;  %v998_v24 = vsub.f32 %v57_v2, %v967_v5  ;;  %v1001_v25 = vand.u32 4294901760, %v989_v21  ;;  %v44_v48 = vld [vmem:[#allocation2 + $0x8] sm:$0xff]  ;;  %v45_v61 = vld [vmem:[#allocation2 + $0x10] sm:$0xff] }
  0x22   :  { %v1004_v26 = vsub.f32 %v56_v3, %v969_v6  ;;  %v43_v27 = vld [vmem:[#allocation2] sm:$0xff]  ;;  %109 = vmatprep.subr.mxu0 %v969_v6  ;;  %v227_v28 = vand.u32 4294901760, %v985_v19  ;;  %v1009_v29 = vand.u32 4294901760, %v991_v22  ;;  %v1012_v30 = vsub.f32 %v55_v7, %v971_v10 }
  0x23   :  { %v73_v31 = vsel %vm71_vm0, %v43_v27, 0  ;;  %111 = vmatpush1.msra.mxu0 %v971_v10  ;;  %v233_v32 = vand.u32 4294901760, %v998_v24  ;;  %v1021_v35 = vsub.f32 %v54_v8, %v973_v11  ;;  %v1029_v38 = vsub.f32 %v53_v9, %v975_v12 }
  0x24   :  { %v239_v33 = vand.u32 4294901760, %v1004_v26  ;;  %v1018_v34 = vand.u32 4294901760, %v73_v31  ;;  %113 = vmatprep.subr.mxu0 %v973_v11  ;;  %v228_v36 = vsub.f32 %v985_v19, %v227_v28  ;;  %v245_v37 = vand.u32 4294901760, %v1012_v30 }
  0x25   :  { %v1032_v39 = vsub.f32 %v52_v13, %v978_v16  ;;  %115 = vmatpush1.msra.mxu0 %v975_v12  ;;  %v234_v40 = vsub.f32 %v998_v24, %v233_v32  ;;  %v251_v43 = vand.u32 4294901760, %v1021_v35  ;;  %v257_v46 = vand.u32 4294901760, %v1029_v38  ;;  %v46_v13 = vld [vmem:[#allocation2 + $0x18] sm:$0xff] }
  0x26   :  { %v240_v41 = vsub.f32 %v1004_v26, %v239_v33  ;;  %v1042_v42 = vsub.f32 %v73_v31, %v1018_v34  ;;  %117 = vmatprep.subr.mxu0 %v978_v16  ;;  %v229_v44 = vand.u32 4294901760, %v228_v36  ;;  %v246_v45 = vsub.f32 %v1012_v30, %v245_v37 }
  0x27   :  { %v263_v47 = vand.u32 4294901760, %v1032_v39  ;;  %119 = vmatpush1.msra.mxu0 %v980_v17  ;;  %v235_v49 = vand.u32 4294901760, %v234_v40  ;;  %v252_v52 = vsub.f32 %v1021_v35, %v251_v43  ;;  %v258_v54 = vsub.f32 %v1029_v38, %v257_v46 }
  0x28   :  { %v241_v50 = vand.u32 4294901760, %v240_v41  ;;  %v163_v51 = vand.u32 4294901760, %v1042_v42  ;;  %121 = vmatprep.subr.mxu0 %v982_v18  ;;  %230 = vmatprep.subr.mxu1 %v229_v44  ;;  %v247_v53 = vand.u32 4294901760, %v246_v45  ;;  %v1064_v56 = vsub.f32 %v51_v14, %v980_v17 }
  0x29   :  { %v264_v55 = vsub.f32 %v1032_v39, %v263_v47  ;;  %123 = vmatpush1.msra.mxu0 %v995_v23  ;;  %236 = vmatpush1.msra.mxu1 %v235_v49  ;;  %v253_v58 = vand.u32 4294901760, %v252_v52  ;;  %v76_v59 = vsel %vm71_vm0, %v44_v48, 0  ;;  %v1072_v60 = vsub.f32 %v50_v15, %v982_v18 }
  0x2a   :  { %v164_v57 = vsub.f32 %v1042_v42, %v163_v51  ;;  %125 = vmatprep.subr.mxu0 %v1001_v25  ;;  %242 = vmatprep.subr.mxu1 %v241_v50  ;;  %v259_v62 = vand.u32 4294901760, %v258_v54  ;;  %v269_v1 = vand.u32 4294901760, %v1064_v56  ;;  %v1076_v2 = vand.u32 4294901760, %v76_v59 }
  0x2b   :  { %v265_v63 = vand.u32 4294901760, %v264_v55  ;;  %127 = vmatpush1.msra.mxu0 %v1009_v29  ;;  %248 = vmatpush1.msra.mxu1 %v247_v53  ;;  %v275_v7 = vand.u32 4294901760, %v1072_v60  ;;  %v1082_v8 = vsub.f32 %v987_v20, %v995_v23  ;;  %v1086_v9 = vsub.f32 %v989_v21, %v1001_v25 }
  0x2c   :  { %v165_v3 = vand.u32 4294901760, %v164_v57  ;;  %254 = vmatprep.subr.mxu1 %v253_v58  ;;  %v270_v14 = vsub.f32 %v1064_v56, %v269_v1  ;;  %v1092_v15 = vsub.f32 %v76_v59, %v1076_v2  ;;  %380 = vmatprep.subr.mxu0 %v985_v19  ;;  %v1097_v27 = vsub.f32 %v991_v22, %v1009_v29 }
  0x2d   :  { %v79_v20 = vsel %vm71_vm0, %v45_v61, 0  ;;  %260 = vmatpush1.msra.mxu1 %v259_v62  ;;  %v276_v21 = vsub.f32 %v1072_v60, %v275_v7  ;;  %v281_v31 = vand.u32 4294901760, %v1082_v8  ;;  %v287_v36 = vand.u32 4294901760, %v1086_v9 }
  0x2e   :  { %166 = vmatmul.mubr.f32.vlgmr.msra.gmra.mxu0 %v165_v3  ;;  %v1105_v40 = vand.u32 4294901760, %v79_v20  ;;  %266 = vmatprep.subr.mxu1 %v265_v63  ;;  %v271_v41 = vand.u32 4294901760, %v270_v14  ;;  %v174_v22 = vand.u32 4294901760, %v1092_v15  ;;  %v293_v44 = vand.u32 4294901760, %v1097_v27 }
  0x2f   :  { %171 = vmatprep.mubr.f32.mxu0 %v932_v0  ;;  %v82_v45 = vsel %vm71_vm0, %v46_v13, 0  ;;  %v277_v48 = vand.u32 4294901760, %v276_v21  ;;  %v282_v49 = vsub.f32 %v1082_v8, %v281_v31  ;;  %383 = vmatpush1.msra.mxu0 %v998_v24  ;;  %v288_v50 = vsub.f32 %v1086_v9, %v287_v36 }
  0x30   :  { %v1119_v52 = vsub.f32 %v79_v20, %v1105_v40  ;;  %272 = vmatpush1.msra.mxu1 %v271_v41  ;;  %v175_v53 = vsub.f32 %v1092_v15, %v174_v22  ;;  %386 = vmatprep.subr.mxu0 %v1004_v26  ;;  %v294_v54 = vsub.f32 %v1097_v27, %v293_v44  ;;  %v1128_v55 = vand.u32 4294901760, %v82_v45 }
  0x31   :  { %278 = vmatprep.subr.mxu1 %v277_v48  ;;  %v283_v57 = vand.u32 4294901760, %v282_v49  ;;  %v289_v58 = vand.u32 4294901760, %v288_v50  ;;  %389 = vmatpush1.msra.mxu0 %v1012_v30 }
  0x32   :  { %v185_v59 = vand.u32 4294901760, %v1119_v52  ;;  %v176_v61 = vand.u32 4294901760, %v175_v53  ;;  %v295_v62 = vand.u32 4294901760, %v294_v54  ;;  %392 = vmatprep.subr.mxu0 %v1021_v35  ;;  %v1134_v63 = vsub.f32 %v82_v45, %v1128_v55 }
  0x33   :  { %284 = vmatpush1.msra.mxu1 %v283_v57  ;;  %395 = vmatpush1.msra.mxu0 %v1029_v38 }
  0x34   :  { %v186_v3 = vsub.f32 %v1119_v52, %v185_v59  ;;  %177 = vmatmul.mubr.f32.gmra.mxu0 %v176_v61  ;;  %290 = vmatprep.subr.mxu1 %v289_v58  ;;  %v196_v13 = vand.u32 4294901760, %v1134_v63 }
  0x35   :  { %182 = vmatprep.mubr.f32.mxu0 %v932_v0  ;;  %296 = vmatpush1.msra.mxu1 %v295_v62 }
  0x36   :  { %v187_v14 = vand.u32 4294901760, %v186_v3  ;;  %331 = vmatmul.mubr.f32.vlgmr.msra.gmra.mxu1 %v1018_v34  ;;  %500 = vmatprep.subr.mxu1 %v965_v4  ;;  %v197_v20 = vsub.f32 %v1134_v63, %v196_v13 }
  0x37   :  { %502 = vmatpush1.msra.mxu1 %v967_v5  ;;  %398 = vmatprep.subr.mxu0 %v1032_v39 }
  0x38   :  { %188 = vmatmul.mubr.f32.gmra.mxu0 %v187_v14  ;;  %336 = vmatprep.mubr.f32.mxu1 %v932_v0  ;;  %v198_v21 = vand.u32 4294901760, %v197_v20 }
  0x39   :  { %193 = vmatprep.mubr.f32.mxu0 %v932_v0  ;;  %401 = vmatpush1.msra.mxu0 %v1064_v56 }
  0x3a   :  { %504 = vmatprep.subr.mxu1 %v969_v6  ;;  %338 = vmatmul.mubr.f32.gmra.mxu1 %v1076_v2 }
  0x3b   :  { %404 = vmatprep.subr.mxu0 %v1072_v60  ;;  %506 = vmatpush1.msra.mxu1 %v971_v10 }
  0x3c   :  { %199 = vmatmul.mubr.f32.gmra.mxu0 %v198_v21  ;;  %508 = vmatprep.subr.mxu1 %v973_v11 }
  0x3d   :  { %407 = vmatpush1.msra.mxu0 %v1082_v8  ;;  %343 = vmatprep.mubr.f32.mxu1 %v932_v0 }
  0x3e   :  { %410 = vmatprep.subr.mxu0 %v1086_v9  ;;  %446 = vmatprep.mubr.f32.mxu0 %v932_v0 }
  0x3f   :  { %413 = vmatpush1.msra.mxu0 %v1097_v27  ;;  %510 = vmatpush1.msra.mxu1 %v975_v12 }
  0x40   :  { %345 = vmatmul.mubr.f32.gmra.mxu1 %v1105_v40  ;;  %449 = vmatmul.mubr.f32.vlgmr.msra.gmra.mxu0 %v1042_v42  ;;  %v59_v42 = vld [vmem:[%s1260_s2] sm:$0x3]  ;;  %s933_s2 = smov [#allocation7]  }
  0x41   :  { %512 = vmatprep.subr.mxu1 %v978_v16  ;;  %350 = vmatprep.mubr.f32.mxu1 %v932_v0  ;;  %s839_s26 = sshll.u32 %s933_s2, 4  ;;  %s840_s26 = int_to_ptr.vmem [resolvable:$true] %s839_s26 }
  0x42   :  { %514 = vmatpush1.msra.mxu1 %v980_v17  ;;  %454 = vmatprep.mubr.f32.mxu0 %v932_v0  ;;  %s900_s27 = scalar_lea.vmem %s840_s26, 1024  ;;  %p905_p11 = scmp.lt.s32.totalorder %s840_s26, %s840_s26 }
  0x43   :  { %516 = vmatprep.subr.mxu1 %v982_v18  ;;  %615 = vmatprep.subr.mxu0 %v227_v28  ;;  %v61_v28 = vlaneseq  ;;  %p901_p10 = scmp.ne.s32.totalorder %s840_s26, %s900_s27  ;;  %p906_p12 = scmp.lt.s32.totalorder %s900_s27, %s900_s27 }
  0x44   :  { %352 = vmatmul.mubr.f32.gmra.mxu1 %v1128_v55  ;;  %457 = vmatmul.mubr.f32.gmra.mxu0 %v1092_v15 }
  0x45   :  { %518 = vmatpush1.msra.mxu1 %v995_v23  ;;  %619 = vmatpush1.msra.mxu0 %v233_v32  ;;  %p907_p13 = por %p906_p12, %p905_p11 }
  0x46   :  { %520 = vmatprep.subr.mxu1 %v1001_v25  ;;  %623 = vmatprep.subr.mxu0 %v239_v33  ;;  %v62_v33 = vshrl.u32 %v61_v28, 7 }
  0x47   :  { %462 = vmatprep.mubr.f32.mxu0 %v932_v0  ;;  %522 = vmatpush1.msra.mxu1 %v1009_v29  ;;  %p908_p0 = pnand %p907_p13, %p901_p10 }
  0x48   :  { %555 = vmatprep.mubr.f32.mxu1 %v932_v0  ;;  %627 = vmatpush1.msra.mxu0 %v245_v37  ;;  %v63_v37 = vsub.s32 0, %v62_v33 }
  0x49   :  { %465 = vmatmul.mubr.f32.gmra.mxu0 %v1119_v52  ;;  %559 = vmatmul.mubr.f32.vlgmr.msra.gmra.mxu1 %v163_v51  ;;  %v67_v51 = vsub.s32 1, %v62_v33 }
  0x4a   :  { %631 = vmatprep.subr.mxu0 %v251_v43  ;;  %742 = vmatprep.subr.mxu1 %v965_v4 }
  0x4b   :  { %635 = vmatpush1.msra.mxu0 %v257_v46  ;;  %744 = vmatpush1.msra.mxu1 %v967_v5 }
  0x4c   :  { %639 = vmatprep.subr.mxu0 %v263_v47  ;;  %470 = vmatprep.mubr.f32.mxu0 %v932_v0  ;;  %v64_v47 = vrot.slane %v59_v42, %v63_v37 }
  0x4d   :  { %564 = vmatprep.mubr.f32.mxu1 %v932_v0  ;;  %643 = vmatpush1.msra.mxu0 %v269_v1 }
  0x4e   :  { %746 = vmatprep.subr.mxu1 %v969_v6  ;;  %473 = vmatmul.mubr.f32.gmra.mxu0 %v1134_v63 }
  0x4f   :  { %568 = vmatmul.mubr.f32.gmra.mxu1 %v174_v22  ;;  %647 = vmatprep.subr.mxu0 %v275_v7  ;;  %v68_v7 = vrot.slane %v59_v42, %v67_v51 }
  0x50   :  { %748 = vmatpush1.msra.mxu1 %v971_v10  ;;  %651 = vmatpush1.msra.mxu0 %v281_v31 }
  0x51   :  { %655 = vmatprep.subr.mxu0 %v287_v36  ;;  %750 = vmatprep.subr.mxu1 %v973_v11 }
  0x52   :  { %573 = vmatprep.mubr.f32.mxu1 %v932_v0  ;;  %659 = vmatpush1.msra.mxu0 %v293_v44 }
  0x53   :  { %692 = vmatprep.mubr.f32.mxu0 %v932_v0  ;;  %752 = vmatpush1.msra.mxu1 %v975_v12 }
  0x54   :  { %577 = vmatmul.mubr.f32.gmra.mxu1 %v185_v59  ;;  %694 = vmatmul.mubr.f32.vlgmr.msra.gmra.mxu0 %v1018_v34 }
  0x55   :  { %754 = vmatprep.subr.mxu1 %v978_v16  ;;  %582 = vmatprep.mubr.f32.mxu1 %v932_v0 }
  0x56   :  { %756 = vmatpush1.msra.mxu1 %v980_v17  ;;  %699 = vmatprep.mubr.f32.mxu0 %v932_v0 }
  0x57   :  { %758 = vmatprep.subr.mxu1 %v982_v18 }
  0x58   :  { %586 = vmatmul.mubr.f32.gmra.mxu1 %v196_v13  ;;  %701 = vmatmul.mubr.f32.gmra.mxu0 %v1076_v2 }
  0x59   :  { %760 = vmatpush1.msra.mxu1 %v995_v23  ;;  %706 = vmatprep.mubr.f32.mxu0 %v932_v0 }
  0x5a   :  { %762 = vmatprep.subr.mxu1 %v1001_v25  ;;  %797 = vmatprep.mubr.f32.mxu1 %v932_v0 }
  0x5b   :  { %764 = vmatpush1.msra.mxu1 %v1009_v29 }
  0x5c   :  { %708 = vmatmul.mubr.f32.gmra.mxu0 %v1105_v40  ;;  %799 = vmatmul.mubr.f32.vlgmr.msra.gmra.mxu1 %v1018_v34 }
  0x5d   :  { %713 = vmatprep.mubr.f32.mxu0 %v932_v0  ;;  %804 = vmatprep.mubr.f32.mxu1 %v932_v0 }
  0x60   :  { %715 = vmatmul.mubr.f32.gmra.mxu0 %v1128_v55  ;;  %806 = vmatmul.mubr.f32.gmra.mxu1 %v1076_v2 }
  0x61   :  { %811 = vmatprep.mubr.f32.mxu1 %v932_v0 }
  0x64   :  { %813 = vmatmul.mubr.f32.gmra.mxu1 %v1105_v40 }
  0x65   :  { %818 = vmatprep.mubr.f32.mxu1 %v932_v0 }
  0x68   :  { %820 = vmatmul.mubr.f32.gmra.mxu1 %v1128_v55 }
  0xee   :  { %v167_v4 = vpop.f32.mrf.mxu0 }
  0xef   :  { %v168_v2 = vadd.f32 %v167_v4, %v64_v47 }
  0xf0   :  { %v169_v5 = vpop.f32.mrf.mxu0 }
  0xf1   :  { %v170_v27 = vadd.f32 %v169_v5, %v68_v7 }
  0xf4   :  { %v178_v6 = vpop.f32.mrf.mxu0 }
  0xf5   :  { %v179_v31 = vadd.f32 %v178_v6, %v64_v47 }
  0xf6   :  { %v180_v10 = vpop.f32.mrf.mxu0  ;;  %v332_v11 = vpop.f32.mrf.mxu1 }
  0xf7   :  { %v333_v36 = vadd.f32 %v332_v11, %v168_v2  ;;  %v181_v50 = vadd.f32 %v180_v10, %v68_v7 }
  0xf8   :  { %v189_v12 = vpop.f32.mrf.mxu0  ;;  %v334_v16 = vpop.f32.mrf.mxu1 }
  0xf9   :  { %v335_v22 = vadd.f32 %v334_v16, %v170_v27  ;;  %v190_v45 = vadd.f32 %v189_v12, %v64_v47 }
  0xfa   :  { %v191_v17 = vpop.f32.mrf.mxu0  ;;  %v339_v18 = vpop.f32.mrf.mxu1 }
  0xfb   :  { %v340_v52 = vadd.f32 %v339_v18, %v179_v31  ;;  %v192_v63 = vadd.f32 %v191_v17, %v68_v7 }
  0xfc   :  { %v200_v19 = vpop.f32.mrf.mxu0  ;;  %v341_v23 = vpop.f32.mrf.mxu1 }
  0xfd   :  { %v342_v58 = vadd.f32 %v341_v23, %v181_v50  ;;  %v201_v3 = vadd.f32 %v200_v19, %v64_v47 }
  0xfe   :  { %v1243_v24 = vpop.f32.mrf.mxu0 }
  0xff   :  { %v203_v28 = vadd.f32 %v1243_v24, %v68_v7 }
 0x100   :  { %v346_v25 = vpop.f32.mrf.mxu1  ;;  %v450_v26 = vpop.f32.mrf.mxu0 }
 0x101   :  { %v451_v44 = vadd.f32 %v450_v26, %v333_v36  ;;  %v347_v13 = vadd.f32 %v346_v25, %v190_v45 }
 0x102   :  { %v348_v29 = vpop.f32.mrf.mxu1  ;;  %v452_v0 = vpop.f32.mrf.mxu0 }
 0x103   :  { %v453_v53 = vadd.f32 %v452_v0, %v335_v22  ;;  %v349_v11 = vadd.f32 %v348_v29, %v192_v63 }
 0x104   :  { %v353_v30 = vpop.f32.mrf.mxu1  ;;  %v458_v32 = vpop.f32.mrf.mxu0 }
 0x105   :  { %v459_v59 = vadd.f32 %v458_v32, %v340_v52  ;;  %v354_v0 = vadd.f32 %v353_v30, %v201_v3 }
 0x106   :  { %v1245_v34 = vpop.f32.mrf.mxu1  ;;  %v460_v35 = vpop.f32.mrf.mxu0 }
 0x107   :  { %v461_v21 = vadd.f32 %v460_v35, %v342_v58  ;;  %v356_v35 = vadd.f32 %v1245_v34, %v203_v28 }
 0x109   :  { %v466_v38 = vpop.f32.mrf.mxu0  ;;  %v560_v39 = vpop.f32.mrf.mxu1 }
 0x10a   :  { %v561_v54 = vadd.f32 %v560_v39, %v451_v44  ;;  %v467_v16 = vadd.f32 %v466_v38, %v347_v13 }
 0x10b   :  { %v468_v43 = vpop.f32.mrf.mxu0  ;;  %v562_v46 = vpop.f32.mrf.mxu1 }
 0x10c   :  { %v563_v61 = vadd.f32 %v562_v46, %v453_v53  ;;  %v469_v19 = vadd.f32 %v468_v43, %v349_v11 }
 0x10e   :  { %v474_v56 = vpop.f32.mrf.mxu0 }
 0x10f   :  { %v569_v60 = vpop.f32.mrf.mxu1  ;;  %v475_v39 = vadd.f32 %v474_v56, %v354_v0 }
 0x110   :  { %v476_v1 = vpop.f32.mrf.mxu0  ;;  %v570_v4 = vadd.f32 %v569_v60, %v459_v59 }
 0x111   :  { %v571_v8 = vpop.f32.mrf.mxu1  ;;  %v477_v51 = vadd.f32 %v476_v1, %v356_v35 }
 0x112   :  { %v572_v18 = vadd.f32 %v571_v8, %v461_v21 }
 0x114   :  { %v578_v9 = vpop.f32.mrf.mxu1  ;;  %v695_v15 = vpop.f32.mrf.mxu0 }
 0x115   :  { %v696_v62 = vadd.f32 %v695_v15, %v561_v54  ;;  %v579_v25 = vadd.f32 %v578_v9, %v467_v16 }
 0x116   :  { %v580_v40 = vpop.f32.mrf.mxu1  ;;  %v697_v41 = vpop.f32.mrf.mxu0 }
 0x117   :  { %v698_v5 = vadd.f32 %v697_v41, %v563_v61  ;;  %v581_v42 = vadd.f32 %v580_v40, %v469_v19 }
 0x118   :  { %v587_v48 = vpop.f32.mrf.mxu1  ;;  %v702_v49 = vpop.f32.mrf.mxu0 }
 0x119   :  { %v703_v26 = vadd.f32 %v702_v49, %v570_v4  ;;  %v588_v60 = vadd.f32 %v587_v48, %v475_v39 }
 0x11a   :  { %v589_v55 = vpop.f32.mrf.mxu1  ;;  %v704_v57 = vpop.f32.mrf.mxu0 }
 0x11b   :  { %v705_v32 = vadd.f32 %v704_v57, %v572_v18  ;;  %v590_v7 = vadd.f32 %v589_v55, %v477_v51 }
 0x11c   :  { %v709_v14 = vpop.f32.mrf.mxu0  ;;  %v800_v20 = vpop.f32.mrf.mxu1 }
 0x11d   :  { %v801_v6 = vadd.f32 %v800_v20, %v696_v62  ;;  %v710_v38 = vadd.f32 %v709_v14, %v579_v25 }
 0x11e   :  { %v711_v10 = vpop.f32.mrf.mxu0  ;;  %v802_v12 = vpop.f32.mrf.mxu1 }
 0x11f   :  { %826 = vst [vmem:[#allocation7] sm:$0xff] %v801_v6  ;;  %v803_v23 = vadd.f32 %v802_v12, %v698_v5  ;;  %v712_v24 = vadd.f32 %v711_v10, %v581_v42 }
 0x120   :  { %v807_v17 = vpop.f32.mrf.mxu1  ;;  %v716_v37 = vpop.f32.mrf.mxu0 }
 0x121   :  { %827 = vst [vmem:[#allocation7 + $0x8] sm:$0xff] %v803_v23  ;;  %v808_v33 = vadd.f32 %v807_v17, %v703_v26  ;;  %v717_v8 = vadd.f32 %v716_v37, %v588_v60 }
 0x122   :  { %v809_v29 = vpop.f32.mrf.mxu1  ;;  %v718_v43 = vpop.f32.mrf.mxu0 }
 0x123   :  { %828 = vst [vmem:[#allocation7 + $0x10] sm:$0xff] %v808_v33  ;;  %v810_v46 = vadd.f32 %v809_v29, %v705_v32  ;;  %v719_v56 = vadd.f32 %v718_v43, %v590_v7 }
 0x124   :  { %v814_v47 = vpop.f32.mrf.mxu1 }
 0x125   :  { %829 = vst [vmem:[#allocation7 + $0x18] sm:$0xff] %v810_v46  ;;  %v815_v30 = vadd.f32 %v814_v47, %v710_v38 }
 0x126   :  { %v816_v2 = vpop.f32.mrf.mxu1 }
 0x127   :  { %830 = vst [vmem:[#allocation7 + $0x20] sm:$0xff] %v815_v30  ;;  %v817_v9 = vadd.f32 %v816_v2, %v712_v24 }
 0x128   :  { %v821_v34 = vpop.f32.mrf.mxu1 }
 0x129   :  { %831 = vst [vmem:[#allocation7 + $0x28] sm:$0xff] %v817_v9  ;;  %v822_v15 = vadd.f32 %v821_v34, %v717_v8 }
 0x12a   :  { %v823_v27 = vpop.f32.mrf.mxu1 }
 0x12b   :  { %832 = vst [vmem:[#allocation7 + $0x30] sm:$0xff] %v822_v15  ;;  %v824_v31 = vadd.f32 %v823_v27, %v719_v56 }
 0x12d   :  { %833 = vst [vmem:[#allocation7 + $0x38] sm:$0xff] %v824_v31 }
 0x12e   :  { %911 = shalt.err (!%p908_p0)
}
 0x12f   :  { %845 = dma.vmem_to_hbm [thread:$0]  %s840_s26, 1024, %s1261_s3, [#allocation4], %s930_s22, %s930_s22, %s931_s23  }
 0x130   :  { %924 = dma.done.wait [#allocation4], 1024  }
 0x131   :  { %925 = vsyncadd [#allocation4], 4294966272 }
 0x132   :  { %849 = vsyncpa [#allocation3], 1 }
 0x133   :  { %850 = vsyncpa [#allocation6], 1 }
 0x134   :  { %851 = vsyncpa [#allocation4], 1 }

</bundles_post_ra>
